<compile_context>
chip_gen: v5e
topology: v5e:2x2
jax: 0.10.0
libtpu: 0.0.40
codegen_flags: <defaults>
</compile_context>

<pallas_src>
import jax
import jax.numpy as jnp
import numpy as np
from jax import lax
from jax.experimental import pallas as pl
from jax.experimental.pallas import tpu as pltpu

# --- Config replicating the external R dict of the PyTorch script ---
R = {
    "full_net": [4, 32, 32, 2],  # layer widths (input, hidden..., output)
    "ActFuc": 3,                 # 3 -> Act_op: relu(x)**3
    "asi": True,                 # antisymmetric second branch
}


def _act(h):
    a = R["ActFuc"]
    if a == 0:
        return jnp.maximum(h, 0.0)
    elif a == 1:
        return jnp.tanh(h)
    elif a == 3:
        r = jnp.maximum(h, 0.0)
        return r * r * r
    else:
        # TODO(synk): ActFuc 2/4 reference nn.sin / nn.sigmoid, which do not
        # exist in torch either; fall through as identity.
        return h


def _round_up(n, m):
    return ((n + m - 1) // m) * m


def _choose_tile(B, tm_max):
    """Pick the batch (lane) tile.

    * B <= 256: single block equal to the full array dims (always layout-legal,
      no boundary handling, grid=1).
    * B  > 256: multiple-of-128 tile sized so the grid has >= 2 steps (v7x
      megacore) but capped at tm_max.  Ragged last tiles are handled by Pallas'
      block-boundary clipping, not host-side padding.
    VMEM is never the constraint here (params ~5 KiB, activations ~70*tm*4 B),
    so the same large tile is used on v5e/v6e/v7x.
    """
    tm_max = max(128, (tm_max // 128) * 128)
    if B <= 256:
        return B
    half = _round_up(pl.cdiv(B, 2), 128)
    return min(tm_max, half)


# --- Kernel -----------------------------------------------------------------
def network_kernel(x_ref, *refs):
    """refs = (w0, b0, w1, b1, ..., w_final_combined, out_ref).

    x_ref is (TM, in_dim) (natural layout); the first matmul folds the
    transpose by contracting in_dim of W0 with in_dim of x, producing
    lane-dense (hidden, TM) activations.  Weights are (out, in); biases are
    (out, 1) so the bias add lane-broadcasts.  out_ref is (out_dim, TM).
    """
    o_ref = refs[-1]
    params = refs[:-1]
    n_hidden = len(R["full_net"]) - 2

    x = x_ref[...]                           # (TM, in_dim), f32
    w0 = params[0][...]                      # (h0 or out, in_dim)
    # (h0, in) x (TM, in) contracted on in_dim -> (h0, TM): transpose folded
    # into the MXU feed path (same pattern as q @ k^T in flash attention).
    h = lax.dot_general(
        w0, x, (((1,), (1,)), ((), ())),
        preferred_element_type=jnp.float32,
    )
    if n_hidden >= 1:
        h = _act(h + params[1][...])         # bias (h0, 1) lane-broadcasts
        k = 2
        for _ in range(n_hidden - 1):
            w = params[k][...]               # (out, in)
            b = params[k + 1][...]           # (out, 1)
            k += 2
            h = _act(jnp.dot(w, h, preferred_element_type=jnp.float32) + b)
        w_final = params[k][...]             # (out_dim, hidden); ASI folded in
        h = jnp.dot(w_final, h, preferred_element_type=jnp.float32)
    o_ref[...] = h.astype(o_ref.dtype)       # lane-dense (out_dim, TM) store


# --- Wrapper ----------------------------------------------------------------
def network_forward(x, hidden_params, w_last, w2_last=None, tm_max=8192,
                    return_transposed=False):
    """x: (B, in_dim) f32.  hidden_params: flat [w0, b0, w1, b1, ...] with
    w_i (out, in), b_i (out, 1).  w_last / w2_last: (out_dim, hidden).

    Returns (B, out_dim) like the PyTorch module, or (out_dim, B) lane-dense
    if return_transposed=True (saves the final small transpose for consumers
    that can take it)."""
    in_dim = R["full_net"][0]
    out_dim = R["full_net"][-1]
    B = x.shape[0]

    if R["asi"]:
        assert w2_last is not None
        # block2 shares ALL hidden weights/biases with block (both built from
        # w_Univ0/b_Univ0 in the module), so hidden activations are identical
        # and block(x) + block2(x) == hidden(x) @ (W_last + W2_last)^T.
        w_final = w_last + w2_last
    else:
        w_final = w_last

    tm = _choose_tile(B, tm_max)
    grid = (pl.cdiv(B, tm),)

    params = list(hidden_params) + [w_final]

    # x tiled along batch (sublanes in, lanes out); weights/biases full-array
    # blocks with constant index_map -> VMEM-resident, no re-DMA across steps.
    in_specs = [pl.BlockSpec((tm, in_dim), lambda i: (i, 0))]
    in_specs += [pl.BlockSpec(p.shape, lambda i: (0, 0)) for p in params]
    out_spec = pl.BlockSpec((out_dim, tm), lambda i: (0, i))

    # Advisory cost hint so XLA schedules the surrounding graph well.
    widths = R["full_net"]
    flops = 2 * B * sum(widths[i] * widths[i + 1] for i in range(len(widths) - 1))
    param_bytes = int(sum(int(p.size) * p.dtype.itemsize for p in params))
    bytes_accessed = int(B * (in_dim + out_dim) * 4 + param_bytes)

    outT = pl.pallas_call(
        network_kernel,
        out_shape=jax.ShapeDtypeStruct((out_dim, B), jnp.float32),
        grid=grid,
        in_specs=in_specs,
        out_specs=out_spec,
        compiler_params=pltpu.CompilerParams(
            dimension_semantics=("parallel",),
        ),
        cost_estimate=pl.CostEstimate(
            flops=int(flops), transcendentals=0, bytes_accessed=bytes_accessed
        ),
    )(x, *params)

    if return_transposed:
        return outT            # (out_dim, B), lane-dense
    return outT.T              # (B, out_dim), PyTorch-native layout


# --- Pure-JAX reference (mirrors the PyTorch forward, no collapse) ----------
def network_reference(x, hidden_params, w_last, w2_last=None):
    n_hidden = len(R["full_net"]) - 2
    h = x
    k = 0
    for _ in range(n_hidden):
        w = hidden_params[k]          # (out, in)
        b = hidden_params[k + 1]      # (out, 1)
        k += 2
        h = _act(h @ w.T + b.reshape(1, -1))
    out = h @ w_last.T
    if R["asi"]:
        out = out + h @ w2_last.T
    return out


# --- Deterministic parameter construction (synthetic; no checkpoint) --------
def init_params(key):
    widths = R["full_net"]
    n_hidden = len(widths) - 2
    keys = jax.random.split(key, 2 * n_hidden + 1)
    hidden = []
    for i in range(n_hidden):
        w = 0.1 * jax.random.normal(
            keys[2 * i], (widths[i + 1], widths[i]), jnp.float32
        )  # PyTorch layout (out, in)
        b = 0.1 * jax.random.normal(keys[2 * i + 1], (widths[i + 1], 1), jnp.float32)
        hidden += [w, b]
    w_last = 0.1 * jax.random.normal(
        keys[-1], (widths[-1], widths[-2]), jnp.float32
    )
    # Faithful ASI: block2 shares hidden params, final weight negated.
    w2_last = -w_last
    return hidden, w_last, w2_last


if __name__ == "__main__":
    key = jax.random.PRNGKey(0)
    k_x, k_x2, k_x3, k_p, k_w2 = jax.random.split(key, 5)

    batch = 8
    x = jax.random.normal(k_x, (batch, R["full_net"][0]), jnp.float32)

    hidden_params, w_last, w2_last = init_params(k_p)

    # Faithful forward (ASI parameters -> output is exactly ~0 by construction).
    out = jax.block_until_ready(network_forward(x, hidden_params, w_last, w2_last))
    ref = network_reference(x, hidden_params, w_last, w2_last)
    np.testing.assert_allclose(np.asarray(out), np.asarray(ref), rtol=1e-5, atol=1e-5)

    # Non-degenerate validation: alternative final weight for block2 (hidden
    # weights still shared, as in the module) so both terms contribute.
    w2_alt = 0.1 * jax.random.normal(
        k_w2, (R["full_net"][-1], R["full_net"][-2]), jnp.float32
    )
    out2 = jax.block_until_ready(network_forward(x, hidden_params, w_last, w2_alt))
    ref2 = network_reference(x, hidden_params, w_last, w2_alt)
    np.testing.assert_allclose(np.asarray(out2), np.asarray(ref2), rtol=1e-5, atol=1e-5)

    # Multi-tile batch grid with a ragged last tile (B=300 -> tm=256, grid=2).
    x_big = jax.random.normal(k_x2, (300, R["full_net"][0]), jnp.float32)
    out3 = jax.block_until_ready(network_forward(x_big, hidden_params, w_last, w2_alt))
    ref3 = network_reference(x_big, hidden_params, w_last, w2_alt)
    np.testing.assert_allclose(np.asarray(out3), np.asarray(ref3), rtol=1e-5, atol=1e-5)

    # Capped-tile path: B=1000, tm_max=256 -> grid=4 with a ragged last tile,
    # plus the lane-dense (out_dim, B) return path.
    x_wide = jax.random.normal(k_x3, (1000, R["full_net"][0]), jnp.float32)
    out4T = jax.block_until_ready(
        network_forward(x_wide, hidden_params, w_last, w2_alt, tm_max=256,
                        return_transposed=True)
    )
    ref4 = network_reference(x_wide, hidden_params, w_last, w2_alt)
    np.testing.assert_allclose(np.asarray(out4T.T), np.asarray(ref4),
                               rtol=1e-5, atol=1e-5)

    print("KERNEL_OK")
</pallas_src>

<mosaic_0001>
module attributes {stable_mosaic.version = 11 : i64} {
  func.func @network_kernel(%arg0: i32, %arg1: memref<8x4xf32, #tpu.memory_space<vmem>>, %arg2: memref<32x4xf32, #tpu.memory_space<vmem>>, %arg3: memref<32x1xf32, #tpu.memory_space<vmem>>, %arg4: memref<32x32xf32, #tpu.memory_space<vmem>>, %arg5: memref<32x1xf32, #tpu.memory_space<vmem>>, %arg6: memref<2x32xf32, #tpu.memory_space<vmem>>, %arg7: memref<2x8xf32, #tpu.memory_space<vmem>>) attributes {dimension_semantics = [#tpu.dimension_semantics<parallel>], iteration_bounds = array<i64: 1>, scalar_prefetch = 0 : i64, scratch_operands = 0 : i64, tpu.core_type = #tpu.core_type<tc>, window_params = [{transform_indices = @transform_0, window_bounds = array<i64: 8, 4>}, {pipeline_mode = #tpu.pipeline_mode<synchronous>, transform_indices = @transform_1, window_bounds = array<i64: 32, 4>}, {pipeline_mode = #tpu.pipeline_mode<synchronous>, transform_indices = @transform_2, window_bounds = array<i64: 32, 1>}, {pipeline_mode = #tpu.pipeline_mode<synchronous>, transform_indices = @transform_3, window_bounds = array<i64: 32, 32>}, {pipeline_mode = #tpu.pipeline_mode<synchronous>, transform_indices = @transform_4, window_bounds = array<i64: 32, 1>}, {pipeline_mode = #tpu.pipeline_mode<synchronous>, transform_indices = @transform_5, window_bounds = array<i64: 2, 32>}, {transform_indices = @transform_6, window_bounds = array<i64: 2, 8>}]} {
    %c0 = arith.constant 0 : index
    %c0_0 = arith.constant 0 : index
    %0 = vector.load %arg1[%c0, %c0_0] : memref<8x4xf32, #tpu.memory_space<vmem>>, vector<8x4xf32>
    %c0_1 = arith.constant 0 : index
    %c0_2 = arith.constant 0 : index
    %1 = vector.load %arg2[%c0_1, %c0_2] : memref<32x4xf32, #tpu.memory_space<vmem>>, vector<32x4xf32>
    %cst = arith.constant dense<0.000000e+00> : vector<32x8xf32>
    %2 = tpu.matmul %1, %0, %cst {dimension_numbers = #tpu.dot_dimension_numbers<[1], [1], [0], [0], [0, 0, 1, 0], [], []>} : vector<32x4xf32>, vector<8x4xf32>, vector<32x8xf32> -> vector<32x8xf32>
    %c0_3 = arith.constant 0 : index
    %c0_4 = arith.constant 0 : index
    %3 = vector.load %arg3[%c0_3, %c0_4] : memref<32x1xf32, #tpu.memory_space<vmem>>, vector<32x1xf32>
    %4 = vector.broadcast %3 : vector<32x1xf32> to vector<32x8xf32>
    %5 = arith.addf %2, %4 : vector<32x8xf32>
    %cst_5 = arith.constant 0.000000e+00 : f32
    %6 = vector.broadcast %cst_5 : f32 to vector<32x8xf32>
    %7 = arith.maximumf %5, %6 : vector<32x8xf32>
    %8 = arith.mulf %7, %7 : vector<32x8xf32>
    %9 = arith.mulf %8, %7 : vector<32x8xf32>
    %c0_6 = arith.constant 0 : index
    %c0_7 = arith.constant 0 : index
    %10 = vector.load %arg4[%c0_6, %c0_7] : memref<32x32xf32, #tpu.memory_space<vmem>>, vector<32x32xf32>
    %c0_8 = arith.constant 0 : index
    %c0_9 = arith.constant 0 : index
    %11 = vector.load %arg5[%c0_8, %c0_9] : memref<32x1xf32, #tpu.memory_space<vmem>>, vector<32x1xf32>
    %cst_10 = arith.constant dense<0.000000e+00> : vector<32x8xf32>
    %12 = tpu.matmul %10, %9, %cst_10 {dimension_numbers = #tpu.dot_dimension_numbers<[1], [0], [0], [1], [0, 0, 1, 1], [], []>} : vector<32x32xf32>, vector<32x8xf32>, vector<32x8xf32> -> vector<32x8xf32>
    %13 = vector.broadcast %11 : vector<32x1xf32> to vector<32x8xf32>
    %14 = arith.addf %12, %13 : vector<32x8xf32>
    %cst_11 = arith.constant 0.000000e+00 : f32
    %15 = vector.broadcast %cst_11 : f32 to vector<32x8xf32>
    %16 = arith.maximumf %14, %15 : vector<32x8xf32>
    %17 = arith.mulf %16, %16 : vector<32x8xf32>
    %18 = arith.mulf %17, %16 : vector<32x8xf32>
    %c0_12 = arith.constant 0 : index
    %c0_13 = arith.constant 0 : index
    %19 = vector.load %arg6[%c0_12, %c0_13] : memref<2x32xf32, #tpu.memory_space<vmem>>, vector<2x32xf32>
    %cst_14 = arith.constant dense<0.000000e+00> : vector<2x8xf32>
    %20 = tpu.matmul %19, %18, %cst_14 {dimension_numbers = #tpu.dot_dimension_numbers<[1], [0], [0], [1], [0, 0, 1, 1], [], []>} : vector<2x32xf32>, vector<32x8xf32>, vector<2x8xf32> -> vector<2x8xf32>
    %c0_15 = arith.constant 0 : index
    %c0_16 = arith.constant 0 : index
    %21 = vector.load %arg7[%c0_15, %c0_16] : memref<2x8xf32, #tpu.memory_space<vmem>>, vector<2x8xf32>
    tpu.vector_store %arg7[%c0_15, %c0_16], %20 {strides = array<i32>} : memref<2x8xf32, #tpu.memory_space<vmem>>, vector<2x8xf32>,
    return
  }
  func.func @transform_0(%arg0: i32) -> (i32, i32) {
    %c0_i32 = arith.constant 0 : i32
    %c0_i32_0 = arith.constant 0 : i32
    return %arg0, %c0_i32 : i32, i32
  }
  func.func @transform_1(%arg0: i32) -> (i32, i32) {
    %c0_i32 = arith.constant 0 : i32
    %c0_i32_0 = arith.constant 0 : i32
    %c0_i32_1 = arith.constant 0 : i32
    return %c0_i32, %c0_i32_0 : i32, i32
  }
  func.func @transform_2(%arg0: i32) -> (i32, i32) {
    %c0_i32 = arith.constant 0 : i32
    %c0_i32_0 = arith.constant 0 : i32
    %c0_i32_1 = arith.constant 0 : i32
    return %c0_i32, %c0_i32_0 : i32, i32
  }
  func.func @transform_3(%arg0: i32) -> (i32, i32) {
    %c0_i32 = arith.constant 0 : i32
    %c0_i32_0 = arith.constant 0 : i32
    %c0_i32_1 = arith.constant 0 : i32
    return %c0_i32, %c0_i32_0 : i32, i32
  }
  func.func @transform_4(%arg0: i32) -> (i32, i32) {
    %c0_i32 = arith.constant 0 : i32
    %c0_i32_0 = arith.constant 0 : i32
    %c0_i32_1 = arith.constant 0 : i32
    return %c0_i32, %c0_i32_0 : i32, i32
  }
  func.func @transform_5(%arg0: i32) -> (i32, i32) {
    %c0_i32 = arith.constant 0 : i32
    %c0_i32_0 = arith.constant 0 : i32
    %c0_i32_1 = arith.constant 0 : i32
    return %c0_i32, %c0_i32_0 : i32, i32
  }
  func.func @transform_6(%arg0: i32) -> (i32, i32) {
    %c0_i32 = arith.constant 0 : i32
    %c0_i32_0 = arith.constant 0 : i32
    return %c0_i32, %arg0 : i32, i32
  }
}

</mosaic_0001>

<bundles_post_ra>
// kernel: tpu_custom_call.1
= control target key start
LH: loop header
LB: loop body
LE: loop exit
PB: predicated region body
PF: predicated region fallthrough
CT: control target
= control target key end

     0   :  { %vm53_vm0 = vcmask 31744   ;;  %v284_v3 = vmov 0   ;;  %s389_s0 = inlined_call_operand.vmem [shape: f32[8,4], index: 0, kind: input, shape index: {}]   ;;  %s390_s1 = inlined_call_operand.vmem [shape: f32[32,4], index: 1, kind: input, shape index: {}]   ;;  %s391_s2 = inlined_call_operand.vmem [shape: f32[32,1], index: 2, kind: input, shape index: {}]   ;;  %s392_s3 = inlined_call_operand.vmem [shape: f32[32,32], index: 3, kind: input, shape index: {}]   ;;  %s393_s4 = inlined_call_operand.vmem [shape: f32[32,1], index: 4, kind: input, shape index: {}]   ;;  %s394_s5 = inlined_call_operand.vmem [shape: f32[2,32], index: 5, kind: input, shape index: {}]   ;;  %s395_s6 = inlined_call_operand.hbm [shape: f32[2,8], index: 6, kind: output, shape index: {}]  }
   0x1   :  { %v24_v0 = vld [vmem:[%s389_s0] sm:$0xff]  ;;  %v32_v1 = vld [vmem:[%s391_s2 + $0x18] sm:$0xff]  ;;  %256 = vset.pattern.permute.xlu1 %v284_v3  ;;  %v30_v4 = vld [vmem:[%s391_s2 + $0x8] sm:$0xff]  ;;  %255 = vset.pattern.permute.xlu0 %v284_v3 }
   0x2   :  { %234 = vmatpush.xpose.msk.msra.mxu0 %vm53_vm0, %v24_v0  ;;  %v25_v2 = vld [vmem:[%s390_s1] sm:$0xff]  ;;  %40 = vperm.xlu1 %256, %v30_v4   ;;  %v28_v5 = vld [vmem:[%s390_s1 + $0x18] sm:$0xff] }
   0x3   :  { %50 = vperm.xlu0 %255, %v32_v1   ;;  %244 = vmatpush.xpose.msk.msra.mxu1 %vm53_vm0, %v24_v0 }
   0x4   :  { %11 = vsyncpa [#allocation3], 0  ;;  %257 = vset.pattern.permute.xlu2 %v284_v3  ;;  %v29_v6 = vld [vmem:[%s391_s2] sm:$0xff]  ;;  %v31_v7 = vld [vmem:[%s391_s2 + $0x10] sm:$0xff]  ;;  %vm138_vm1 = vcmask 261120   ;;  %s285_s28 = smov [#allocation2]  }
   0x5   :  { %235 = vmatmul.msk.f32.vlgmr.msra.gmra.mxu0 %vm53_vm0, %v25_v2  ;;  %v26_v8 = vld [vmem:[%s390_s1 + $0x8] sm:$0xff]  ;;  %v114_v9 = vld [vmem:[%s393_s4] sm:$0xff]  ;;  %v27_v11 = vld [vmem:[%s390_s1 + $0x10] sm:$0xff]  ;;  %s223_s0 = sshll.u32 %s285_s28, 4  ;;  %s225_s7 = sshll.u32 %s395_s6, 4  ;;  %vm216_vm2 = vcmask 58368   ;;  %s224_s0 = int_to_ptr.vmem [resolvable:$true] %s223_s0  ;;  %s226_s7 = int_to_ptr.hbm [resolvable:$true] %s225_s7 }
   0x6   :  { %238 = vmatmul.msk.f32.vlgmr.msra.gmra.mxu1 %vm53_vm0, %v28_v5  ;;  %v115_v10 = vld [vmem:[%s393_s4 + $0x8] sm:$0xff]  ;;  %v117_v19 = vld [vmem:[%s393_s4 + $0x18] sm:$0xff]  ;;  %v116_v24 = vld [vmem:[%s393_s4 + $0x10] sm:$0xff] }
   0x7   :  { %135 = vperm.xlu2 %257, %v117_v19   ;;  %v110_v38 = vld [vmem:[%s392_s3] sm:$0xff]  ;;  %v111_v39 = vld [vmem:[%s392_s3 + $0x8] sm:$0xff]  ;;  %v112_v40 = vld [vmem:[%s392_s3 + $0x10] sm:$0xff] }
   0x8   :  { %v113_v41 = vld [vmem:[%s392_s3 + $0x18] sm:$0xff]  ;;  %v192_v2 = vld [vmem:[%s394_s5] sm:$0x3] }
   0xa   :  { %35 = vperm.xlu1 %256, %v29_v6  }
   0xb   :  { %45 = vperm.xlu0 %255, %v31_v7  }
   0xd   :  { %236 = vmatmul.msk.f32.gmra.mxu0 %vm53_vm0, %v26_v8 }
   0xf   :  { %130 = vperm.xlu2 %257, %v116_v24  }
  0x12   :  { %120 = vperm.xlu1 %256, %v114_v9  }
  0x13   :  { %125 = vperm.xlu0 %255, %v115_v10  }
  0x15   :  { %237 = vmatmul.msk.f32.gmra.mxu0 %vm53_vm0, %v27_v11 }
  0x61   :  { %v136_v42 = vpop.permute.xlu2 %135 }
  0x69   :  { %v131_v44 = vpop.permute.xlu2 %130 }
  0x74   :  { %v41_v13 = vpop.permute.xlu1 %40 }
  0x75   :  { %v51_v14 = vpop.permute.xlu0 %50 }
  0x7c   :  { %v36_v22 = vpop.permute.xlu1 %35 }
  0x7d   :  { %v46_v26 = vpop.permute.xlu0 %45 }
  0x82   :  { %v86_v12 = vpop.f32.mrf.mxu0 }
  0x83   :  { %v95_v15 = vpop.f32.mrf.mxu1  ;;  %v87_v25 = vadd.f32 %v86_v12, %v36_v22 }
  0x84   :  { %v96_v16 = vadd.f32 %v95_v15, %v51_v14  ;;  %v121_v50 = vpop.permute.xlu1 %120 }
  0x85   :  { %v98_v30 = vmax.f32 %v87_v25, 0.0  ;;  %v126_v47 = vpop.permute.xlu0 %125 }
  0x86   :  { %v101_v17 = vmax.f32 %v96_v16, 0.0 }
  0x87   :  { %v102_v34 = vmul.f32 %v98_v30, %v98_v30 }
  0x88   :  { %v105_v18 = vmul.f32 %v101_v17, %v101_v17 }
  0x89   :  { %v106_v37 = vmul.f32 %v102_v34, %v98_v30 }
  0x8a   :  { %v89_v20 = vpop.f32.mrf.mxu0  ;;  %v109_v21 = vmul.f32 %v105_v18, %v101_v17 }
  0x8b   :  { %v90_v23 = vadd.f32 %v89_v20, %v41_v13 }
  0x8c   :  { %163 = vmatpush.msrb.mxu1 %v109_v21  ;;  %245 = vmatpush.msra.mxu2 %v109_v21 }
  0x8d   :  { %246 = vmatpush.msra.mxu3 %v109_v21  ;;  %v99_v28 = vmax.f32 %v90_v23, 0.0 }
  0x8f   :  { %v103_v32 = vmul.f32 %v99_v28, %v99_v28 }
  0x91   :  { %v107_v36 = vmul.f32 %v103_v32, %v99_v28 }
  0x92   :  { %v92_v27 = vpop.f32.mrf.mxu0 }
  0x93   :  { %v93_v29 = vadd.f32 %v92_v27, %v46_v26 }
  0x95   :  { %v100_v31 = vmax.f32 %v93_v29, 0.0 }
  0x97   :  { %v104_v33 = vmul.f32 %v100_v31, %v100_v31 }
  0x99   :  { %v108_v35 = vmul.f32 %v104_v33, %v100_v31 }
  0x9b   :  { %164 = vmatpush.msrb.mxu1 %v108_v35  ;;  %247 = vmatpush.msra.mxu2 %v108_v35 }
  0x9c   :  { %248 = vmatpush.msra.mxu3 %v108_v35 }
  0x9d   :  { %165 = vmatpush.msrb.mxu1 %v107_v36  ;;  %249 = vmatpush.msra.mxu2 %v107_v36 }
  0x9e   :  { %250 = vmatpush.msra.mxu3 %v107_v36 }
  0x9f   :  { %166 = vmatpush.msrb.mxu1 %v106_v37  ;;  %251 = vmatpush.msra.mxu2 %v106_v37 }
  0xa0   :  { %252 = vmatpush.msra.mxu3 %v106_v37  ;;  %239 = vmatmul.msk.f32.vlgmr.msrb.gmra.mxu1 %vm138_vm1, %v110_v38 }
  0xa1   :  { %240 = vmatmul.msk.f32.vlgmr.msra.gmra.mxu2 %vm138_vm1, %v111_v39  ;;  %241 = vmatmul.msk.f32.vlgmr.msra.gmra.mxu3 %vm138_vm1, %v112_v40 }
  0xa9   :  { %242 = vmatmul.msk.f32.gmra.mxu3 %vm138_vm1, %v113_v41 }
 0x11d   :  { %v168_v48 = vpop.f32.mrf.mxu1 }
 0x11e   :  { %v169_v52 = vadd.f32 %v168_v48, %v121_v50 }
 0x120   :  { %v180_v57 = vmax.f32 %v169_v52, 0.0 }
 0x122   :  { %v184_v62 = vmul.f32 %v180_v57, %v180_v57 }
 0x124   :  { %v174_v43 = vpop.f32.mrf.mxu3  ;;  %v171_v45 = vpop.f32.mrf.mxu2  ;;  %v188_v1 = vmul.f32 %v184_v62, %v180_v57 }
 0x125   :  { %v175_v46 = vadd.f32 %v174_v43, %v131_v44  ;;  %v172_v49 = vadd.f32 %v171_v45, %v126_v47 }
 0x127   :  { %v182_v53 = vmax.f32 %v175_v46, 0.0  ;;  %v181_v55 = vmax.f32 %v172_v49, 0.0 }
 0x129   :  { %v186_v58 = vmul.f32 %v182_v53, %v182_v53  ;;  %v185_v60 = vmul.f32 %v181_v55, %v181_v55 }
 0x12b   :  { %v190_v63 = vmul.f32 %v186_v58, %v182_v53  ;;  %v189_v0 = vmul.f32 %v185_v60, %v181_v55 }
 0x12c   :  { %v177_v51 = vpop.f32.mrf.mxu3 }
 0x12d   :  { %v178_v54 = vadd.f32 %v177_v51, %v136_v42 }
 0x12f   :  { %v183_v56 = vmax.f32 %v178_v54, 0.0 }
 0x131   :  { %v187_v59 = vmul.f32 %v183_v56, %v183_v56 }
 0x133   :  { %v191_v61 = vmul.f32 %v187_v59, %v183_v56 }
 0x135   :  { %208 = vmatpush.msrb.mxu2 %v191_v61 }
 0x137   :  { %209 = vmatpush.msrb.mxu2 %v190_v63 }
 0x139   :  { %210 = vmatpush.msrb.mxu2 %v189_v0 }
 0x13b   :  { %211 = vmatpush.msrb.mxu2 %v188_v1 }
 0x13c   :  { %243 = vmatmul.msk.f32.vlgmr.msrb.gmra.mxu2 %vm138_vm1, %v192_v2 }
 0x1bf   :  { %v213_v3 = vpop.f32.mrf.mxu2 }
 0x1c0   :  { %217 = vst.msk [vmem:[#allocation2] sm:$0x3] %vm216_vm2, %v213_v3 }
 0x1c1   :  { %228 = dma.vmem_to_hbm [thread:$0]  %s224_s0, 32, %s226_s7, [#allocation3]  }
 0x1c2   :  { %282 = dma.done.wait [#allocation3], 32  }
 0x1c3   :  { %283 = vsyncadd [#allocation3], 4294967264 }
 0x1c4   :  { %233 = vsyncpa [#allocation3], 1 }

</bundles_post_ra>
